<compile_context>
chip_gen: v7x
topology: tpu7x:2x2x1
jax: 0.10.0
libtpu: 0.0.40
codegen_flags: <defaults>
</compile_context>

<pallas_src>
import functools

import jax
import jax.numpy as jnp
from jax.experimental import pallas as pl
from jax.experimental.pallas import tpu as pltpu


def _round_up(x, m):
    return ((x + m - 1) // m) * m


def _vmem_limit_bytes():
    """Generation-aware VMEM limit: physical capacity minus headroom.

    v7x (64 MiB phys)  -> ~56 MiB;  v5e/v6e (128 MiB phys) -> ~112 MiB.
    Falls back to the most conservative (v7x-class) value if the query fails.
    """
    try:
        phys = int(pltpu.get_tpu_info().vmem_capacity_bytes)
    except Exception:
        phys = 64 << 20
    headroom = max(8 << 20, phys // 8)
    return max(32 << 20, phys - headroom)


def _pick_tiles(batch, d_in, d_out, num_cores, budget_bytes):
    """Pick (tb, tn): batch tile (multiple of 8) and D_out tile (multiple of 128).

    Prefers >= 4 pipeline steps per core (so the double-buffer pipeline can
    hide HBM latency on small batches) and the largest tiles that fit the
    per-core VMEM budget, assuming bf16 streaming + f32 accumulator.
    """
    rows_per_core = pl.cdiv(batch, num_cores)
    tb_pref = max(8, min(1024, _round_up(pl.cdiv(rows_per_core, 4), 8)))

    def need(tb, tn, w_bufs):
        return (2 * 2 * tb * d_in          # x tiles (bf16, double-buffered)
                + 2 * 2 * tb * tn          # target tiles (bf16, double-buffered)
                + w_bufs * 2 * d_in * tn   # resident weight N-slab (bf16)
                + w_bufs * 2 * tn          # bias N-slab (bf16)
                + 4 * tb * tn              # f32 squared-error accumulator
                + 2 * 4 * 8 * 128)         # (8,128) partial-sum output block

    tn_cands = []
    for t in (d_out, 4096, 2048, 1024, 512, 256, 128):
        if t <= d_out and d_out % t == 0 and t not in tn_cands:
            tn_cands.append(t)

    for tn in tn_cands:
        w_bufs = 1 if tn == d_out else 2   # Buffered(1) only when W is grid-constant
        tb = tb_pref
        while tb > 8 and need(tb, tn, w_bufs) > budget_bytes:
            tb = max(8, (tb // 2 // 8) * 8)
        if need(tb, tn, w_bufs) <= budget_bytes:
            return tb, tn

    # TODO(synk): add K (D_in) tiling for pathologically wide inputs whose
    # (D_in, 128) weight slab alone exceeds VMEM; not needed for realistic widths.
    return 8, 128


def _linear_mse_kernel(x_ref, w_ref, b_ref, t_ref, part_ref, acc_ref, *, inv_denom):
    """One (core, n_tile, batch_tile) grid step.

    axis 0 "parallel"  : megacore split of the (padded) batch
    axis 1 "arbitrary" : output-feature (D_out) tiles
    axis 2 "arbitrary" : reduction over this core's batch tiles
    """
    i = pl.program_id(2)

    @pl.when(i == 0)
    def _():
        acc_ref[...] = jnp.zeros_like(acc_ref)

    # ---- model forward: y = x @ W + b (bf16 operands, f32 MXU accumulate) ----
    y = jnp.dot(x_ref[...], w_ref[...], preferred_element_type=jnp.float32)
    y = y + b_ref[...].astype(jnp.float32)

    # ---- criterion: accumulate squared error elementwise (pure VPU) ----
    d = y - t_ref[...].astype(jnp.float32)
    acc_ref[...] += d * d

    # ---- finalize per (core, n_tile): one XLU reduction + mean factor ----
    # NOTE: part_ref's block index is constant along axis 2 (the reduction
    # axis), so writing only on the last step is safe; keep that invariant.
    @pl.when(i == pl.num_programs(2) - 1)
    def _():
        part = jnp.sum(acc_ref[...]) * inv_denom
        part_ref[...] = jnp.full(part_ref.shape, part, dtype=part_ref.dtype)


def model_with_criterion(samples, w, b, targets, *, num_cores=2,
                         stream_dtype=jnp.bfloat16):
    """Scalar MSE loss (mean reduction) of Linear(samples) vs targets.

    Inputs are deliberately streamed in bf16 (bandwidth-bound kernel); all
    accumulation is f32, so accuracy matches a bf16-input f32-math reference.
    """
    B, D_in = samples.shape
    D_out = w.shape[1]
    assert w.shape == (D_in, D_out) and b.shape == (D_out,)
    assert targets.shape == (B, D_out)
    # lane-dense feature dims (pad feature dims to a multiple of 128 upstream)
    assert D_in % 128 == 0 and D_out % 128 == 0

    vmem_limit = _vmem_limit_bytes()
    tb, tn = _pick_tiles(B, D_in, D_out, num_cores, vmem_limit - (8 << 20))
    n_tiles = D_out // tn
    tiles_per_core = pl.cdiv(pl.cdiv(B, num_cores), tb)
    b_padded = num_cores * tiles_per_core * tb

    # bf16 streaming copies
    x = samples.astype(stream_dtype)
    wq = w.astype(stream_dtype)
    bq = b.astype(stream_dtype).reshape(1, D_out)
    t = targets.astype(stream_dtype)

    # Ragged / tiny batches: pad samples with zero rows and targets with the
    # (bf16) bias row -> padded rows produce y == target exactly, contributing
    # zero squared error.  The mean divisor below uses the ORIGINAL B.
    if b_padded != B:
        pad = b_padded - B
        x = jnp.concatenate([x, jnp.zeros((pad, D_in), x.dtype)], axis=0)
        t = jnp.concatenate(
            [t, jnp.broadcast_to(bq, (pad, D_out)).astype(t.dtype)], axis=0)

    inv_denom = 1.0 / float(B * D_out)
    kernel = functools.partial(_linear_mse_kernel, inv_denom=inv_denom)

    # weight/bias blocks are grid-constant when n_tiles == 1 -> single buffer
    w_kwargs = dict(pipeline_mode=pl.Buffered(1)) if n_tiles == 1 else {}

    partials = pl.pallas_call(
        kernel,
        out_shape=jax.ShapeDtypeStruct((num_cores, n_tiles, 8, 128), jnp.float32),
        grid_spec=pltpu.PrefetchScalarGridSpec(
            num_scalar_prefetch=0,
            grid=(num_cores, n_tiles, tiles_per_core),
            in_specs=[
                # samples tile for (core c, batch tile i); re-streamed per n tile
                pl.BlockSpec((tb, D_in), lambda c, n, i: (c * tiles_per_core + i, 0)),
                # weight N-slab, resident across this core's batch loop
                pl.BlockSpec((D_in, tn), lambda c, n, i: (0, n), **w_kwargs),
                # bias N-slab, resident
                pl.BlockSpec((1, tn), lambda c, n, i: (0, n), **w_kwargs),
                # targets tile
                pl.BlockSpec((tb, tn), lambda c, n, i: (c * tiles_per_core + i, n)),
            ],
            out_specs=pl.BlockSpec((1, 1, 8, 128), lambda c, n, i: (c, n, 0, 0)),
            scratch_shapes=[pltpu.VMEM((tb, tn), jnp.float32)],
        ),
        compiler_params=pltpu.CompilerParams(
            # TODO(synk): if profiling shows a single-core run on v7x, switch
            # axis 0 to pltpu.CORE_PARALLEL (plain "parallel" is near-neutral
            # codegen on single-TC chips).
            dimension_semantics=("parallel", "arbitrary", "arbitrary"),
            vmem_limit_bytes=int(vmem_limit)),
    )(x, wq, bq, t)

    # sum per-(core, n-tile) partials; each already carries the 1/(B*D_out) factor
    return jnp.sum(partials[:, :, 0, 0])


if __name__ == "__main__":
    # lane-dense feature dims; ragged batch exercises padding, the megacore
    # split, and multi-tile accumulation (grid = (2, 1, 4) with tb=128).
    B, D_in, D_out = 1000, 256, 128

    key = jax.random.PRNGKey(0)
    k_x, k_w, k_b, k_t = jax.random.split(key, 4)

    samples = jax.random.normal(k_x, (B, D_in), dtype=jnp.float32)
    w = jax.random.normal(k_w, (D_in, D_out), dtype=jnp.float32) * 0.05
    b = jax.random.normal(k_b, (D_out,), dtype=jnp.float32) * 0.1
    targets = jax.random.normal(k_t, (B, D_out), dtype=jnp.float32)

    loss = jax.jit(model_with_criterion)(samples, w, b, targets)
    jax.block_until_ready(loss)

    # Reference with the same deliberate bf16 input rounding but f32 math
    # (exact products, f32 accumulation) -> only reduction order differs.
    xs = samples.astype(jnp.bfloat16).astype(jnp.float32)
    ws = w.astype(jnp.bfloat16).astype(jnp.float32)
    bs = b.astype(jnp.bfloat16).astype(jnp.float32)
    ts = targets.astype(jnp.bfloat16).astype(jnp.float32)
    ref = jnp.mean(
        (jnp.dot(xs, ws, precision=jax.lax.Precision.HIGHEST) + bs[None, :] - ts) ** 2)
    assert jnp.allclose(loss, ref, rtol=1e-3, atol=1e-3), (loss, ref)

    print("KERNEL_OK")
</pallas_src>

<mosaic_0001>
module attributes {stable_mosaic.version = 11 : i64} {
  func.func @_linear_mse_kernel(%arg0: i32, %arg1: i32, %arg2: i32, %arg3: memref<128x256xbf16, #tpu.memory_space<vmem>>, %arg4: memref<256x128xbf16, #tpu.memory_space<vmem>>, %arg5: memref<1x128xbf16, #tpu.memory_space<vmem>>, %arg6: memref<128x128xbf16, #tpu.memory_space<vmem>>, %arg7: memref<1x1x8x128xf32, #tpu.memory_space<vmem>>, %arg8: memref<128x128xf32, #tpu.memory_space<vmem>>) attributes {dimension_semantics = [#tpu.dimension_semantics<parallel>, #tpu.dimension_semantics<arbitrary>, #tpu.dimension_semantics<arbitrary>], iteration_bounds = array<i64: 2, 1, 4>, scalar_prefetch = 0 : i64, scratch_operands = 1 : i64, tpu.core_type = #tpu.core_type<tc>, window_params = [{transform_indices = @transform_0, window_bounds = array<i64: 128, 256>}, {pipeline_mode = #tpu.pipeline_mode<synchronous>, transform_indices = @transform_1, window_bounds = array<i64: 256, 128>}, {pipeline_mode = #tpu.pipeline_mode<synchronous>, transform_indices = @transform_2, window_bounds = array<i64: 1, 128>}, {transform_indices = @transform_3, window_bounds = array<i64: 128, 128>}, {transform_indices = @transform_4, window_bounds = array<i64: 1, 1, 8, 128>}]} {
    %c0_i32 = arith.constant 0 : i32
    %0 = arith.cmpi eq, %arg2, %c0_i32 : i32
    %1 = arith.extui %0 : i1 to i32
    %c0_i32_0 = arith.constant 0 : i32
    %2 = arith.cmpi ne, %1, %c0_i32_0 : i32
    scf.if %2 {
      %cst_13 = arith.constant 0.000000e+00 : f32
      %20 = vector.broadcast %cst_13 : f32 to vector<128x128xf32>
      %c0_14 = arith.constant 0 : index
      %c0_15 = arith.constant 0 : index
      %21 = vector.load %arg8[%c0_14, %c0_15] : memref<128x128xf32, #tpu.memory_space<vmem>>, vector<128x128xf32>
      tpu.vector_store %arg8[%c0_14, %c0_15], %20 {strides = array<i32>} : memref<128x128xf32, #tpu.memory_space<vmem>>, vector<128x128xf32>,
    } else {
    }
    %c0 = arith.constant 0 : index
    %c0_1 = arith.constant 0 : index
    %3 = vector.load %arg3[%c0, %c0_1] : memref<128x256xbf16, #tpu.memory_space<vmem>>, vector<128x256xbf16>
    %c0_2 = arith.constant 0 : index
    %c0_3 = arith.constant 0 : index
    %4 = vector.load %arg4[%c0_2, %c0_3] : memref<256x128xbf16, #tpu.memory_space<vmem>>, vector<256x128xbf16>
    %cst = arith.constant dense<0.000000e+00> : vector<128x128xf32>
    %5 = tpu.matmul %3, %4, %cst {dimension_numbers = #tpu.dot_dimension_numbers<[1], [0], [0], [1], [0, 0, 1, 1], [], []>} : vector<128x256xbf16>, vector<256x128xbf16>, vector<128x128xf32> -> vector<128x128xf32>
    %c0_4 = arith.constant 0 : index
    %c0_5 = arith.constant 0 : index
    %6 = vector.load %arg5[%c0_4, %c0_5] : memref<1x128xbf16, #tpu.memory_space<vmem>>, vector<1x128xbf16>
    %7 = arith.extf %6 : vector<1x128xbf16> to vector<1x128xf32>
    %8 = vector.broadcast %7 : vector<1x128xf32> to vector<128x128xf32>
    %9 = arith.addf %5, %8 : vector<128x128xf32>
    %c0_6 = arith.constant 0 : index
    %c0_7 = arith.constant 0 : index
    %10 = vector.load %arg6[%c0_6, %c0_7] : memref<128x128xbf16, #tpu.memory_space<vmem>>, vector<128x128xbf16>
    %11 = arith.extf %10 : vector<128x128xbf16> to vector<128x128xf32>
    %12 = arith.subf %9, %11 : vector<128x128xf32>
    %c0_8 = arith.constant 0 : index
    %c0_9 = arith.constant 0 : index
    %13 = vector.load %arg8[%c0_8, %c0_9] : memref<128x128xf32, #tpu.memory_space<vmem>>, vector<128x128xf32>
    %14 = arith.mulf %12, %12 : vector<128x128xf32>
    %15 = arith.addf %13, %14 : vector<128x128xf32>
    %c0_10 = arith.constant 0 : index
    %c0_11 = arith.constant 0 : index
    %16 = vector.load %arg8[%c0_10, %c0_11] : memref<128x128xf32, #tpu.memory_space<vmem>>, vector<128x128xf32>
    tpu.vector_store %arg8[%c0_10, %c0_11], %15 {strides = array<i32>} : memref<128x128xf32, #tpu.memory_space<vmem>>, vector<128x128xf32>,
    %c3_i32 = arith.constant 3 : i32
    %17 = arith.cmpi eq, %arg2, %c3_i32 : i32
    %18 = arith.extui %17 : i1 to i32
    %c0_i32_12 = arith.constant 0 : i32
    %19 = arith.cmpi ne, %18, %c0_i32_12 : i32
    scf.if %19 {
      %c0_13 = arith.constant 0 : index
      %c0_14 = arith.constant 0 : index
      %20 = vector.load %arg8[%c0_13, %c0_14] : memref<128x128xf32, #tpu.memory_space<vmem>>, vector<128x128xf32>
      %21 = vector.shape_cast %20 : vector<128x128xf32> to vector<1x128x128xf32>
      %cst_15 = arith.constant dense<0.000000e+00> : vector<1xf32>
      %22 = vector.multi_reduction <add>, %21, %cst_15 [1, 2] : vector<1x128x128xf32> to vector<1xf32>
      %23 = vector.shape_cast %22 : vector<1xf32> to vector<1x1x1xf32>
      %24 = vector.extract %23[0, 0, 0] : f32 from vector<1x1x1xf32>
      %cst_16 = arith.constant 7.812500e-06 : f32
      %25 = arith.mulf %24, %cst_16 : f32
      %26 = vector.broadcast %25 : f32 to vector<1x1x8x128xf32>
      %c0_17 = arith.constant 0 : index
      %c0_18 = arith.constant 0 : index
      %c0_19 = arith.constant 0 : index
      %c0_20 = arith.constant 0 : index
      %27 = vector.load %arg7[%c0_17, %c0_18, %c0_19, %c0_20] : memref<1x1x8x128xf32, #tpu.memory_space<vmem>>, vector<1x1x8x128xf32>
      tpu.vector_store %arg7[%c0_17, %c0_18, %c0_19, %c0_20], %26 {strides = array<i32>} : memref<1x1x8x128xf32, #tpu.memory_space<vmem>>, vector<1x1x8x128xf32>,
    } else {
    }
    return
  }
  func.func @transform_0(%arg0: i32, %arg1: i32, %arg2: i32) -> (i32, i32) {
    %c4_i32 = arith.constant 4 : i32
    %0 = arith.muli %arg0, %c4_i32 : i32
    %1 = arith.addi %0, %arg2 : i32
    %c0_i32 = arith.constant 0 : i32
    %c0_i32_0 = arith.constant 0 : i32
    return %1, %c0_i32 : i32, i32
  }
  func.func @transform_1(%arg0: i32, %arg1: i32, %arg2: i32) -> (i32, i32) {
    %c0_i32 = arith.constant 0 : i32
    %c0_i32_0 = arith.constant 0 : i32
    return %c0_i32, %arg1 : i32, i32
  }
  func.func @transform_2(%arg0: i32, %arg1: i32, %arg2: i32) -> (i32, i32) {
    %c0_i32 = arith.constant 0 : i32
    %c0_i32_0 = arith.constant 0 : i32
    return %c0_i32, %arg1 : i32, i32
  }
  func.func @transform_3(%arg0: i32, %arg1: i32, %arg2: i32) -> (i32, i32) {
    %c4_i32 = arith.constant 4 : i32
    %0 = arith.muli %arg0, %c4_i32 : i32
    %1 = arith.addi %0, %arg2 : i32
    %c0_i32 = arith.constant 0 : i32
    return %1, %arg1 : i32, i32
  }
  func.func @transform_4(%arg0: i32, %arg1: i32, %arg2: i32) -> (i32, i32, i32, i32) {
    %c0_i32 = arith.constant 0 : i32
    %c0_i32_0 = arith.constant 0 : i32
    %c0_i32_1 = arith.constant 0 : i32
    return %arg0, %arg1, %c0_i32, %c0_i32_0 : i32, i32, i32, i32
  }
}

</mosaic_0001>

<bundles_post_ra>
// kernel: model_with_criterion.1
= control target key start
LH: loop header
LB: loop body
LE: loop exit
PB: predicated region body
PF: predicated region fallthrough
CT: control target
= control target key end

     0   :  { %s1271_s15 = smov 0   ;;  %s1273_s16 = smov 0   ;;  %s1430_s0 = inlined_call_operand.vmem [shape: bf16[1024,256], index: 0, kind: input, shape index: {}]   ;;  %s1431_s1 = inlined_call_operand.vmem [shape: bf16[256,128], index: 1, kind: input, shape index: {}]   ;;  %s1432_s2 = inlined_call_operand.vmem [shape: bf16[1,128], index: 2, kind: input, shape index: {}]   ;;  %s1433_s3 = inlined_call_operand.vmem [shape: bf16[1024,128], index: 3, kind: input, shape index: {}]   ;;  %s1434_s4 = inlined_call_operand.vmem [shape: f32[2,1,8,128], index: 4, kind: output, shape index: {}]  }
   0x1   :  { %s1275_s17 = smov 0   ;;  %s1277_s18 = smov 0  }
   0x2   :  { %s1279_s19 = smov 0  }
   0x3 LB: > { %s26_s20 = sadd.s32 1, %s1235_s17  ;;  %s33_s21 = sadd.s32 1, %s1239_s18  ;;  %s1243_s19 = sphi %s1279_s19, %s14_s19   ;;  %s1239_s18 = sphi %s1277_s18, %s1438_s18   ;;  %s1235_s17 = sphi %s1275_s17, %s1437_s17   ;;  %s1231_s16 = sphi %s1273_s16, %s1436_s16   ;;  %s1227_s15 = sphi %s1271_s15, %s1435_s15  }
   0x4   : > { %p27_p0 = scmp.ge.s32.totalorder %s26_s20, 4  ;;  %p957_p1 = scmp.ge.s32.totalorder %s1243_s19, 1 }
   0x5   : > { %p234_p2 = scmp.lt.s32.totalorder %s1243_s19, 9 }
   0x6   : > { %s1440_s20 = smov (%p27_p0, %s26_s20), 0  ;;  %s1442_s21 = smov (!%p27_p0, %s33_s21), %s1239_s18 }
   0x7   : > { %p235_p3 = pnand %p957_p1, %p234_p2  ;;  %p35_p4 = scmp.ge.s32.totalorder %s1442_s21, 2 }
   0x8   : > { %s958_s22 = sshll.u32 (!%p235_p3), %s1231_s16, 2  ;;  %p313_p5 = scmp.lt.s32.totalorder (!%p235_p3), %s1231_s16, 1 }
   0x9   : > { %s1444_s21 = smov (%p35_p4, %s1442_s21), 0  ;;  %238 = sbr.rel (%p235_p3) target bundleno = 543 (0x21f), region = 36 }
   0xa   : > { %s283_s23 = sadd.s32 (!%p235_p3), %s1227_s15, %s958_s22  ;;  %p966_p7 = scmp.ne.s32.totalorder (!%p235_p3), %s1227_s15, 0 }
   0xb   : > { %s959_s24 = sshll.u32 (!%p235_p3), %s283_s23, 4 }
   0xc   : > { %p285_p6 = scmp.lt.s32.totalorder (!%p235_p3), %s959_s24, 127 }
  0x10   : > { %s1446_s16 = smov (!%p313_p5, %s1231_s16), 1  ;;  %s1448_s24 = smov (!%p285_p6, %s959_s24), 127 }
  0x11   : > { %s965_s25 = sshll.u32 %s1446_s16, 3  ;;  %s1002_s26 = sshll.u32 %s1448_s24, 3  ;;  %v1245_v0 = vmov (!%p966_p7), 0.0  }
  0x12   : > { %s964_s27 = sshll.u32 %s1448_s24, 2  ;;  %s1307_s30 = scalar_lea.vmem %s1430_s0, %s1002_s26  ;;  %325 = vst [vmem:[#allocation2] sm:$0xff] (!%p966_p7), %v1245_v0  ;;  %326 = vst [vmem:[#allocation2 + $0x8] sm:$0xff] (!%p966_p7), %v1245_v0 }
  0x13   : > { %s1312_s7 = scalar_lea.vmem %s1433_s3, %s964_s27  ;;  %s1317_s10 = scalar_lea.vmem %s1434_s4, %s965_s25  ;;  %327 = vst [vmem:[#allocation2 + $0x10] sm:$0xff] (!%p966_p7), %v1245_v0  ;;  %328 = vst [vmem:[#allocation2 + $0x18] sm:$0xff] (!%p966_p7), %v1245_v0 }
  0x14   : > { %324 = sbr.rel (%p966_p7) target bundleno = 27 (0x1b), region = 40  ;;  %329 = vst [vmem:[#allocation2 + $0x20] sm:$0xff] (!%p966_p7), %v1245_v0  ;;  %330 = vst [vmem:[#allocation2 + $0x28] sm:$0xff] (!%p966_p7), %v1245_v0 }
  0x15   : > { %331 = vst [vmem:[#allocation2 + $0x30] sm:$0xff] (!%p966_p7), %v1245_v0  ;;  %332 = vst [vmem:[#allocation2 + $0x38] sm:$0xff] (!%p966_p7), %v1245_v0 }
  0x16   : > { %333 = vst [vmem:[#allocation2 + $0x40] sm:$0xff] (!%p966_p7), %v1245_v0  ;;  %334 = vst [vmem:[#allocation2 + $0x48] sm:$0xff] (!%p966_p7), %v1245_v0 }
  0x17   : > { %335 = vst [vmem:[#allocation2 + $0x50] sm:$0xff] (!%p966_p7), %v1245_v0  ;;  %336 = vst [vmem:[#allocation2 + $0x58] sm:$0xff] (!%p966_p7), %v1245_v0 }
  0x18   : > { %337 = vst [vmem:[#allocation2 + $0x60] sm:$0xff] (!%p966_p7), %v1245_v0  ;;  %338 = vst [vmem:[#allocation2 + $0x68] sm:$0xff] (!%p966_p7), %v1245_v0 }
  0x19   : > { %339 = vst [vmem:[#allocation2 + $0x70] sm:$0xff] (!%p966_p7), %v1245_v0  ;;  %340 = vst [vmem:[#allocation2 + $0x78] sm:$0xff] (!%p966_p7), %v1245_v0 }
  0x1b PF: > { %v1165_v1 = vld [vmem:[%s1431_s1 + $0x40] sm:$0xff]   ;;  %v1167_v3 = vld [vmem:[%s1431_s1 + $0x48] sm:$0xff]   ;;  %v1169_v5 = vld [vmem:[%s1431_s1 + $0x50] sm:$0xff]   ;;  %v391_v33 = vlaneseq  ;;  %p999_p8 = scmp.ne.s32.totalorder %s1227_s15, 3 }
  0x1c   : > { %v1166_v2 = vld [vmem:[%s1431_s1] sm:$0xff]   ;;  %1042 = vmatprep.subr.bf16.mxu0 %v1165_v1  ;;  %1106 = vmatprep.subr.bf16.mxu1 %v1165_v1  ;;  %v1168_v4 = vld [vmem:[%s1431_s1 + $0x8] sm:$0xff]   ;;  %v1170_v6 = vld [vmem:[%s1431_s1 + $0x10] sm:$0xff]  }
  0x1d   : > { %1043 = vmatpush3.bf16.msra.mxu0 %v1166_v2  ;;  %1114 = vmatpush3.bf16.msra.mxu1 %v1166_v2  ;;  %v1171_v7 = vld [vmem:[%s1431_s1 + $0x58] sm:$0xff]   ;;  %v1173_v9 = vld [vmem:[%s1431_s1 + $0x60] sm:$0xff]   ;;  %v1175_v11 = vld [vmem:[%s1431_s1 + $0x68] sm:$0xff]   ;;  %v392_v34 = vshrl.u32 %v391_v33, 7 }
  0x1e   : > { %1044 = vmatprep.subr.bf16.mxu0 %v1167_v3  ;;  %1107 = vmatprep.subr.bf16.mxu1 %v1167_v3  ;;  %v1172_v8 = vld [vmem:[%s1431_s1 + $0x18] sm:$0xff]   ;;  %v1174_v10 = vld [vmem:[%s1431_s1 + $0x20] sm:$0xff]   ;;  %v1176_v14 = vld [vmem:[%s1431_s1 + $0x28] sm:$0xff]  }
  0x1f   : > { %v1183_v12 = vld [vmem:[%s1307_s30 + $0x4] ss:$8 sps:$4 sm:$0xff]   ;;  %v1177_v15 = vld [vmem:[%s1431_s1 + $0x70] sm:$0xff]   ;;  %v1179_v17 = vld [vmem:[%s1431_s1 + $0x78] sm:$0xff]   ;;  %v393_v37 = vsub.s32 0, %v392_v34 }
  0x20   : > { %v1186_v13 = vld [vmem:[%s1307_s30 + $0x44] ss:$8 sps:$4 sm:$0xff]   ;;  %603 = vmatprep.mubr.bf16.mxu0 %v1183_v12  ;;  %v1178_v16 = vld [vmem:[%s1431_s1 + $0x30] sm:$0xff]   ;;  %v1180_v18 = vld [vmem:[%s1431_s1 + $0x38] sm:$0xff]  }
  0x21   : > { %1045 = vmatpush3.bf16.msra.mxu0 %v1168_v4  ;;  %1115 = vmatpush3.bf16.msra.mxu1 %v1168_v4  ;;  %v1181_v19 = vld [vmem:[%s1307_s30] ss:$8 sps:$4 sm:$0xff]   ;;  %v1187_v21 = vld [vmem:[%s1307_s30 + $0x14] ss:$8 sps:$4 sm:$0xff]   ;;  %v1191_v23 = vld [vmem:[%s1307_s30 + $0x10] ss:$8 sps:$4 sm:$0xff]  }
  0x22   : > { %1046 = vmatprep.subr.bf16.mxu0 %v1169_v5  ;;  %1108 = vmatprep.subr.bf16.mxu1 %v1169_v5  ;;  %v1184_v20 = vld [vmem:[%s1307_s30 + $0x40] ss:$8 sps:$4 sm:$0xff]   ;;  %v1189_v22 = vld [vmem:[%s1307_s30 + $0x54] ss:$8 sps:$4 sm:$0xff]   ;;  %v1192_v24 = vld [vmem:[%s1307_s30 + $0x50] ss:$8 sps:$4 sm:$0xff]  }
  0x23   : > { %635 = vmatprep.mubr.bf16.mxu1 %v1186_v13  ;;  %v1193_v25 = vld [vmem:[%s1307_s30 + $0x24] ss:$8 sps:$4 sm:$0xff]   ;;  %v1197_v27 = vld [vmem:[%s1307_s30 + $0x20] ss:$8 sps:$4 sm:$0xff]   ;;  %v1199_v29 = vld [vmem:[%s1307_s30 + $0x34] ss:$8 sps:$4 sm:$0xff]  }
  0x24   : > { %v1195_v26 = vld [vmem:[%s1307_s30 + $0x64] ss:$8 sps:$4 sm:$0xff]   ;;  %v1198_v28 = vld [vmem:[%s1307_s30 + $0x60] ss:$8 sps:$4 sm:$0xff]   ;;  %v1201_v30 = vld [vmem:[%s1307_s30 + $0x74] ss:$8 sps:$4 sm:$0xff]  }
  0x25   : > { %1047 = vmatpush3.bf16.msra.mxu0 %v1170_v6  ;;  %1116 = vmatpush3.bf16.msra.mxu1 %v1170_v6  ;;  %v1203_v31 = vld [vmem:[%s1307_s30 + $0x30] ss:$8 sps:$4 sm:$0xff]   ;;  %v389_v35 = vld [vmem:[%s1432_s2] sm:$0x1]  ;;  %v1035_v63 = vld [vmem:[%s1312_s7 + $0x8] sm:$0xff]  }
  0x26   : > { %1048 = vmatprep.subr.bf16.mxu0 %v1171_v7  ;;  %1109 = vmatprep.subr.bf16.mxu1 %v1171_v7  ;;  %v1204_v32 = vld [vmem:[%s1307_s30 + $0x70] ss:$8 sps:$4 sm:$0xff]   ;;  %v390_v36 = vunpack.c.l.bf16 %v389_v35  ;;  %v1004_v38 = vld [vmem:[%s1312_s7] sm:$0xff]   ;;  %v1039_v0 = vld [vmem:[%s1312_s7 + $0x28] sm:$0xff]   ;;  %v1009_v12 = vunpack.c.l.bf16 %v1035_v63 }
  0x27   : > { %v1038_v39 = vld [vmem:[%s1312_s7 + $0x20] sm:$0xff]   ;;  %v1005_v46 = vunpack.c.l.bf16 %v1004_v38  ;;  %v1006_v52 = vunpack.c.h.bf16 %v1004_v38  ;;  %v1036_v35 = vld [vmem:[%s1312_s7 + $0x10] sm:$0xff]  }
  0x28   : > { %v1389_v42 = vrot.slane %v390_v36, %v393_v37  ;;  %v1021_v48 = vunpack.c.l.bf16 %v1038_v39  ;;  %v1022_v54 = vunpack.c.h.bf16 %v1038_v39  ;;  %v716_v1 = vld [vmem:[#allocation2] sm:$0xff]  ;;  %v1040_v36 = vld [vmem:[%s1312_s7 + $0x30] sm:$0xff]  }
  0x29   : > { %1049 = vmatpush3.bf16.msra.mxu0 %v1172_v8  ;;  %1117 = vmatpush3.bf16.msra.mxu1 %v1172_v8  ;;  %v724_v2 = vld [vmem:[#allocation2 + $0x40] sm:$0xff]  ;;  %v718_v39 = vld [vmem:[#allocation2 + $0x10] sm:$0xff] }
  0x2a   : > { %1050 = vmatprep.subr.bf16.mxu0 %v1173_v9  ;;  %1110 = vmatprep.subr.bf16.mxu1 %v1173_v9  ;;  %v717_v9 = vld [vmem:[#allocation2 + $0x8] sm:$0xff] }
  0x2d   : > { %1051 = vmatpush3.bf16.msra.mxu0 %v1174_v10  ;;  %1118 = vmatpush3.bf16.msra.mxu1 %v1174_v10  ;;  %v725_v10 = vld [vmem:[#allocation2 + $0x48] sm:$0xff] }
  0x2e   : > { %1052 = vmatprep.subr.bf16.mxu0 %v1175_v11  ;;  %1111 = vmatprep.subr.bf16.mxu1 %v1175_v11 }
  0x31   : > { %1053 = vmatpush3.bf16.msra.mxu0 %v1176_v14  ;;  %1119 = vmatpush3.bf16.msra.mxu1 %v1176_v14  ;;  %v1025_v14 = vunpack.c.l.bf16 %v1039_v0 }
  0x32   : > { %1054 = vmatprep.subr.bf16.mxu0 %v1177_v15  ;;  %1112 = vmatprep.subr.bf16.mxu1 %v1177_v15 }
  0x35   : > { %1055 = vmatpush3.bf16.msra.mxu0 %v1178_v16  ;;  %1120 = vmatpush3.bf16.msra.mxu1 %v1178_v16 }
  0x36   : > { %1056 = vmatprep.subr.bf16.mxu0 %v1179_v17  ;;  %1113 = vmatprep.subr.bf16.mxu1 %v1179_v17 }
  0x39   : > { %1057 = vmatpush3.bf16.msra.mxu0 %v1180_v18  ;;  %1121 = vmatpush3.bf16.msra.mxu1 %v1180_v18 }
  0x3c   : > { %604 = vmatmul.mubr.bf16.vlgmr.msra.gmra.mrb[0].mxu0 %v1181_v19  ;;  %636 = vmatmul.mubr.bf16.vlgmr.msra.gmra.mrb[0].mxu1 %v1184_v20 }
  0x3d   : > { %611 = vmatprep.mubr.bf16.mxu0 %v1187_v21  ;;  %643 = vmatprep.mubr.bf16.mxu1 %v1189_v22 }
  0x44   : > { %612 = vmatmul.mubr.bf16.gmra.mrb[4].mxu0 %v1191_v23  ;;  %644 = vmatmul.mubr.bf16.gmra.mrb[4].mxu1 %v1192_v24  ;;  %v1010_v24 = vunpack.c.h.bf16 %v1035_v63 }
  0x45   : > { %619 = vmatprep.mubr.bf16.mxu0 %v1193_v25  ;;  %651 = vmatprep.mubr.bf16.mxu1 %v1195_v26  ;;  %v1026_v26 = vunpack.c.h.bf16 %v1039_v0 }
  0x4c   : > { %620 = vmatmul.mubr.bf16.gmra.mrb[8].mxu0 %v1197_v27  ;;  %652 = vmatmul.mubr.bf16.gmra.mrb[8].mxu1 %v1198_v28 }
  0x4d   : > { %627 = vmatprep.mubr.bf16.mxu0 %v1199_v29  ;;  %659 = vmatprep.mubr.bf16.mxu1 %v1201_v30 }
  0x54   : > { %628 = vmatmul.mubr.bf16.gmra.mrb[12].mxu0 %v1203_v31  ;;  %660 = vmatmul.mubr.bf16.gmra.mrb[12].mxu1 %v1204_v32 }
 0x10f   : > { %v1058_v40 = vpop.f32.mrb[0].mxu0  ;;  %v1082_v41 = vpop.f32.mrb[0].mxu1 }
 0x110   : > { %v1059_v43 = vpop.f32.mrb[1].mxu0  ;;  %v1083_v44 = vpop.f32.mrb[1].mxu1 }
 0x111   : > { %v1060_v45 = vadd.f32 %v1059_v43, %v1058_v40  ;;  %v1084_v47 = vadd.f32 %v1083_v44, %v1082_v41  ;;  %v1061_v49 = vpop.f32.mrb[2].mxu0  ;;  %v1085_v50 = vpop.f32.mrb[2].mxu1  ;;  %v726_v40 = vld [vmem:[#allocation2 + $0x50] sm:$0xff] }
 0x112   : > { %v1062_v51 = vpop.f32.mrb[3].mxu0  ;;  %v1086_v53 = vpop.f32.mrb[3].mxu1 }
 0x113   : > { %v606_v55 = vadd.f32 %v1060_v45, %v1389_v42  ;;  %v638_v56 = vadd.f32 %v1084_v47, %v1389_v42  ;;  %v1063_v57 = vadd.f32 %v1062_v51, %v1061_v49  ;;  %v1087_v58 = vadd.f32 %v1086_v53, %v1085_v50  ;;  %v727_v49 = vld [vmem:[#allocation2 + $0x58] sm:$0xff] }
 0x114   : > { %v1013_v51 = vunpack.c.l.bf16 %v1036_v35  ;;  %v1029_v53 = vunpack.c.l.bf16 %v1040_v36 }
 0x115   : > { %v700_v59 = vsub.f32 %v606_v55, %v1005_v46  ;;  %v708_v60 = vsub.f32 %v638_v56, %v1021_v48  ;;  %v609_v61 = vadd.f32 %v1063_v57, %v1389_v42  ;;  %v641_v62 = vadd.f32 %v1087_v58, %v1389_v42  ;;  %v719_v48 = vld [vmem:[#allocation2 + $0x18] sm:$0xff] }
 0x117   : > { %v732_v3 = vmul.f32 %v700_v59, %v700_v59  ;;  %v740_v4 = vmul.f32 %v708_v60, %v708_v60  ;;  %v701_v5 = vsub.f32 %v609_v61, %v1006_v52  ;;  %v709_v6 = vsub.f32 %v641_v62, %v1022_v54  ;;  %v1064_v7 = vpop.f32.mrb[4].mxu0  ;;  %v1088_v8 = vpop.f32.mrb[4].mxu1 }
 0x118   : > { %v1065_v11 = vpop.f32.mrb[5].mxu0  ;;  %v1089_v13 = vpop.f32.mrb[5].mxu1 }
 0x119   : > { %v748_v15 = vadd.f32 %v732_v3, %v716_v1  ;;  %v756_v16 = vadd.f32 %v740_v4, %v724_v2  ;;  %v733_v17 = vmul.f32 %v701_v5, %v701_v5  ;;  %v741_v18 = vmul.f32 %v709_v6, %v709_v6  ;;  %v1067_v19 = vpop.f32.mrb[6].mxu0  ;;  %v1091_v20 = vpop.f32.mrb[6].mxu1 }
 0x11a   : > { %v1066_v21 = vadd.f32 %v1065_v11, %v1064_v7  ;;  %v1090_v22 = vadd.f32 %v1089_v13, %v1088_v8  ;;  %v1068_v23 = vpop.f32.mrb[7].mxu0  ;;  %v1092_v25 = vpop.f32.mrb[7].mxu1  ;;  %v1014_v5 = vunpack.c.h.bf16 %v1036_v35  ;;  %v1030_v7 = vunpack.c.h.bf16 %v1040_v36  ;;  %v1041_v11 = vld [vmem:[%s1312_s7 + $0x38] sm:$0xff]   ;;  %v728_v13 = vld [vmem:[#allocation2 + $0x60] sm:$0xff] }
 0x11b   : > { %764 = vst [vmem:[#allocation2] sm:$0xff] %v748_v15  ;;  %772 = vst [vmem:[#allocation2 + $0x40] sm:$0xff] %v756_v16  ;;  %v749_v27 = vadd.f32 %v733_v17, %v717_v9  ;;  %v757_v28 = vadd.f32 %v741_v18, %v725_v10  ;;  %v1069_v29 = vadd.f32 %v1068_v23, %v1067_v19  ;;  %v1037_v10 = vld [vmem:[%s1312_s7 + $0x18] sm:$0xff]  }
 0x11c   : > { %v1093_v30 = vadd.f32 %v1092_v25, %v1091_v20  ;;  %v614_v31 = vadd.f32 %v1066_v21, %v1389_v42  ;;  %v646_v32 = vadd.f32 %v1090_v22, %v1389_v42  ;;  %v1017_v23 = vunpack.c.l.bf16 %v1037_v10 }
 0x11d   : > { %765 = vst [vmem:[#allocation2 + $0x8] sm:$0xff] %v749_v27  ;;  %773 = vst [vmem:[#allocation2 + $0x48] sm:$0xff] %v757_v28  ;;  %v617_v33 = vadd.f32 %v1069_v29, %v1389_v42  ;;  %v1033_v25 = vunpack.c.l.bf16 %v1041_v11  ;;  %v721_v28 = vld [vmem:[#allocation2 + $0x28] sm:$0xff] }
 0x11e   : > { %v649_v34 = vadd.f32 %v1093_v30, %v1389_v42  ;;  %v702_v37 = vsub.f32 %v614_v31, %v1009_v12  ;;  %v710_v38 = vsub.f32 %v646_v32, %v1025_v14  ;;  %v720_v12 = vld [vmem:[#allocation2 + $0x20] sm:$0xff]  ;;  %v729_v29 = vld [vmem:[#allocation2 + $0x68] sm:$0xff] }
 0x11f   : > { %v703_v41 = vsub.f32 %v617_v33, %v1010_v24  ;;  %v1070_v44 = vpop.f32.mrb[8].mxu0  ;;  %v1094_v45 = vpop.f32.mrb[8].mxu1 }
 0x120   : > { %v711_v43 = vsub.f32 %v649_v34, %v1026_v26  ;;  %v734_v46 = vmul.f32 %v702_v37, %v702_v37  ;;  %v742_v47 = vmul.f32 %v710_v38, %v710_v38  ;;  %v1071_v50 = vpop.f32.mrb[9].mxu0  ;;  %v1095_v52 = vpop.f32.mrb[9].mxu1  ;;  %v1018_v37 = vunpack.c.h.bf16 %v1037_v10 }
 0x121   : > { %v735_v54 = vmul.f32 %v703_v41, %v703_v41  ;;  %v1072_v56 = vadd.f32 %v1071_v50, %v1070_v44  ;;  %v1096_v57 = vadd.f32 %v1095_v52, %v1094_v45  ;;  %v1073_v58 = vpop.f32.mrb[10].mxu0  ;;  %v1097_v59 = vpop.f32.mrb[10].mxu1  ;;  %v730_v52 = vld [vmem:[#allocation2 + $0x70] sm:$0xff] }
 0x122   : > { %v743_v55 = vmul.f32 %v711_v43, %v711_v43  ;;  %v750_v60 = vadd.f32 %v734_v46, %v718_v39  ;;  %v758_v61 = vadd.f32 %v742_v47, %v726_v40  ;;  %v1074_v62 = vpop.f32.mrb[11].mxu0  ;;  %v1098_v63 = vpop.f32.mrb[11].mxu1  ;;  %v1034_v39 = vunpack.c.h.bf16 %v1041_v11 }
 0x123   : > { %v751_v0 = vadd.f32 %v735_v54, %v719_v48  ;;  %v622_v2 = vadd.f32 %v1072_v56, %v1389_v42  ;;  %v654_v3 = vadd.f32 %v1096_v57, %v1389_v42  ;;  %v1075_v4 = vadd.f32 %v1074_v62, %v1073_v58  ;;  %v723_v57 = vld [vmem:[#allocation2 + $0x38] sm:$0xff] }
 0x124   : > { %v759_v1 = vadd.f32 %v743_v55, %v727_v49  ;;  %766 = vst [vmem:[#allocation2 + $0x10] sm:$0xff] %v750_v60  ;;  %774 = vst [vmem:[#allocation2 + $0x50] sm:$0xff] %v758_v61  ;;  %v1099_v6 = vadd.f32 %v1098_v63, %v1097_v59  ;;  %v731_v58 = vld [vmem:[#allocation2 + $0x78] sm:$0xff] }
 0x125   : > { %767 = vst [vmem:[#allocation2 + $0x18] sm:$0xff] %v751_v0  ;;  %v704_v8 = vsub.f32 %v622_v2, %v1013_v51  ;;  %v712_v9 = vsub.f32 %v654_v3, %v1029_v53  ;;  %v625_v14 = vadd.f32 %v1075_v4, %v1389_v42  ;;  %v722_v51 = vld [vmem:[#allocation2 + $0x30] sm:$0xff] }
 0x126   : > { %775 = vst [vmem:[#allocation2 + $0x58] sm:$0xff] %v759_v1  ;;  %v657_v15 = vadd.f32 %v1099_v6, %v1389_v42  ;;  %v785_v1 = vld [vmem:[#allocation2 + $0x8] sm:$0xff] (!%p999_p8) }
 0x127   : > { %v736_v16 = vmul.f32 %v704_v8, %v704_v8  ;;  %v744_v17 = vmul.f32 %v712_v9, %v712_v9  ;;  %v1076_v18 = vpop.f32.mrb[12].mxu0  ;;  %v1100_v19 = vpop.f32.mrb[12].mxu1  ;;  %v705_v20 = vsub.f32 %v625_v14, %v1014_v5  ;;  %v792_v14 = vld [vmem:[#allocation2 + $0x40] sm:$0xff] (!%p999_p8) }
 0x128   : > { %v713_v21 = vsub.f32 %v657_v15, %v1030_v7  ;;  %v1077_v22 = vpop.f32.mrb[13].mxu0  ;;  %v1101_v24 = vpop.f32.mrb[13].mxu1 }
 0x129   : > { %v752_v26 = vadd.f32 %v736_v16, %v720_v12  ;;  %v760_v27 = vadd.f32 %v744_v17, %v728_v13  ;;  %v1078_v30 = vadd.f32 %v1077_v22, %v1076_v18  ;;  %v1102_v31 = vadd.f32 %v1101_v24, %v1100_v19  ;;  %v1079_v32 = vpop.f32.mrb[14].mxu0  ;;  %v1103_v33 = vpop.f32.mrb[14].mxu1  ;;  %v793_v16 = vld [vmem:[#allocation2 + $0x48] sm:$0xff] (!%p999_p8) }
 0x12a   : > { %v737_v34 = vmul.f32 %v705_v20, %v705_v20  ;;  %v745_v35 = vmul.f32 %v713_v21, %v713_v21  ;;  %v1080_v36 = vpop.f32.mrb[15].mxu0  ;;  %v1104_v38 = vpop.f32.mrb[15].mxu1 }
 0x12b   : > { %768 = vst [vmem:[#allocation2 + $0x20] sm:$0xff] %v752_v26  ;;  %776 = vst [vmem:[#allocation2 + $0x60] sm:$0xff] %v760_v27  ;;  %v630_v40 = vadd.f32 %v1078_v30, %v1389_v42  ;;  %v662_v41 = vadd.f32 %v1102_v31, %v1389_v42  ;;  %v1081_v43 = vadd.f32 %v1080_v36, %v1079_v32  ;;  %v786_v2 = vld [vmem:[#allocation2 + $0x10] sm:$0xff] (!%p999_p8) }
 0x12c   : > { %v1105_v44 = vadd.f32 %v1104_v38, %v1103_v33  ;;  %v753_v45 = vadd.f32 %v737_v34, %v721_v28  ;;  %v761_v46 = vadd.f32 %v745_v35, %v729_v29  ;;  %v787_v4 = vld [vmem:[#allocation2 + $0x18] sm:$0xff] (!%p999_p8)  ;;  %v794_v18 = vld [vmem:[#allocation2 + $0x50] sm:$0xff] (!%p999_p8) }
 0x12d   : > { %v706_v47 = vsub.f32 %v630_v40, %v1017_v23  ;;  %v714_v48 = vsub.f32 %v662_v41, %v1033_v25  ;;  %v633_v49 = vadd.f32 %v1081_v43, %v1389_v42  ;;  %v795_v20 = vld [vmem:[#allocation2 + $0x58] sm:$0xff] (!%p999_p8) }
 0x12e   : > { %v665_v50 = vadd.f32 %v1105_v44, %v1389_v42  ;;  %769 = vst [vmem:[#allocation2 + $0x28] sm:$0xff] %v753_v45  ;;  %777 = vst [vmem:[#allocation2 + $0x68] sm:$0xff] %v761_v46  ;;  %v784_v42 = vld [vmem:[#allocation2] sm:$0xff] (!%p999_p8) }
 0x12f   : > { %v738_v53 = vmul.f32 %v706_v47, %v706_v47  ;;  %v746_v54 = vmul.f32 %v714_v48, %v714_v48  ;;  %v707_v55 = vsub.f32 %v633_v49, %v1018_v37  ;;  %v800_v3 = vadd.f32 (!%p999_p8), %v785_v1, %v784_v42 }
 0x130   : > { %v715_v56 = vsub.f32 %v665_v50, %v1034_v39  ;;  %783 = sbr.rel (%p999_p8) target bundleno = 543 (0x21f), region = 44 }
 0x131   : > { %v754_v59 = vadd.f32 %v738_v53, %v722_v51  ;;  %v762_v60 = vadd.f32 %v746_v54, %v730_v52  ;;  %v739_v61 = vmul.f32 %v707_v55, %v707_v55  ;;  %v801_v5 = vadd.f32 (!%p999_p8), %v800_v3, %v786_v2 }
 0x132   : > { %v747_v62 = vmul.f32 %v715_v56, %v715_v56  ;;  %v788_v6 = vld [vmem:[#allocation2 + $0x20] sm:$0xff] (!%p999_p8) }
 0x133   : > { %770 = vst [vmem:[#allocation2 + $0x30] sm:$0xff] %v754_v59  ;;  %778 = vst [vmem:[#allocation2 + $0x70] sm:$0xff] %v762_v60  ;;  %v755_v63 = vadd.f32 %v739_v61, %v723_v57  ;;  %v802_v7 = vadd.f32 (!%p999_p8), %v801_v5, %v787_v4  ;;  %v796_v22 = vld [vmem:[#allocation2 + $0x60] sm:$0xff] (!%p999_p8) }
 0x134   : > { %v763_v0 = vadd.f32 %v747_v62, %v731_v58 }
 0x135   : > { %771 = vst [vmem:[#allocation2 + $0x38] sm:$0xff] %v755_v63  ;;  %v789_v8 = vld [vmem:[#allocation2 + $0x28] sm:$0xff] (!%p999_p8)  ;;  %v803_v9 = vadd.f32 (!%p999_p8), %v802_v7, %v788_v6 }
 0x136   : > { %779 = vst [vmem:[#allocation2 + $0x78] sm:$0xff] %v763_v0  ;;  %v797_v24 = vld [vmem:[#allocation2 + $0x68] sm:$0xff] (!%p999_p8) }
 0x137   : > { %v804_v11 = vadd.f32 %v803_v9, %v789_v8 }
 0x13a   : > { %v790_v10 = vld [vmem:[#allocation2 + $0x30] sm:$0xff] }
 0x13b   : > { %v805_v13 = vadd.f32 %v804_v11, %v790_v10  ;;  %v798_v26 = vld [vmem:[#allocation2 + $0x70] sm:$0xff] }
 0x13c   : > { %v791_v12 = vld [vmem:[#allocation2 + $0x38] sm:$0xff] }
 0x13d   : > { %v806_v15 = vadd.f32 %v805_v13, %v791_v12  ;;  %v799_v28 = vld [vmem:[#allocation2 + $0x78] sm:$0xff] }
 0x13f   : > { %v807_v17 = vadd.f32 %v806_v15, %v792_v14 }
 0x141   : > { %v808_v19 = vadd.f32 %v807_v17, %v793_v16 }
 0x143   : > { %v809_v21 = vadd.f32 %v808_v19, %v794_v18 }
 0x145   : > { %v810_v23 = vadd.f32 %v809_v21, %v795_v20 }
 0x147   : > { %v811_v25 = vadd.f32 %v810_v23, %v796_v22 }
 0x149   : > { %v812_v27 = vadd.f32 %v811_v25, %v797_v24 }
 0x14b   : > { %v813_v29 = vadd.f32 %v812_v27, %v798_v26 }
 0x14d   : > { %v814_v30 = vadd.f32 %v813_v29, %v799_v28 }
 0x14f   : > { %815 = vadd.xlane.f32.xlu0 %v814_v30 }
 0x1dc   : > { %v816_v31 = vpop.xlane.xlu0 %815 }
 0x1dd   : > { %v817_v32 = vrot.slane %v816_v31, 4 }
 0x1df   : > { %v818_v33 = vadd.f32 %v817_v32, %v816_v31 }
 0x1e1   : > { %v819_v34 = vrot.slane %v818_v33, 2 }
 0x1e3   : > { %v820_v35 = vadd.f32 %v819_v34, %v818_v33 }
 0x1e5   : > { %v821_v36 = vrot.slane %v820_v35, 1 }
 0x1e7   : > { %v822_v37 = vadd.f32 %v821_v36, %v820_v35 }
 0x1e9   : > { %1122 = vpush %v822_v37 }
 0x21a   : > { %s1123_s15 = spop %1122 }
 0x21b   : > { %s824_s30 = smul.f32 7.8125e-06, %s1123_s15 }
 0x21d   : > { %v825_v38 = vstv %s824_s30 }
 0x21e   : > { %826 = vst [vmem:[%s1317_s10] sm:$0xff] %v825_v38 }
 0x21f PF: > { %s14_s19 = sadd.s32 1, %s1243_s19   ;;  %s1435_s15 = smov %s1235_s17 }
 0x220   : > { %p11_p9 = scmp.ge.s32.totalorder %s14_s19, 10   ;;  %s1436_s16 = smov %s1239_s18 }
 0x221   : > { %s1437_s17 = smov %s1440_s20  ;;  %s1438_s18 = smov %s1444_s21 }
 0x222   :  { %13 = sbr.rel (!%p11_p9) target bundleno = 3 (0x3), region = 83 }

</bundles_post_ra>
